<compile_context>
chip_gen: v7x
topology: tpu7x:2x2x1
jax: 0.10.0
libtpu: 0.0.40
codegen_flags: <defaults>
</compile_context>

<pallas_src>
import functools
import math

import jax
import jax.numpy as jnp
from jax.experimental import pallas as pl
from jax.experimental.pallas import tpu as pltpu


def _bottleneck_kernel(x_ref, w1_ref, b1_ref, w2_ref, b2_ref, w3_ref, b3_ref,
                       out_ref, *, length):
    """One grid step: a lane-major slab covering b_tile batch elements.

    x_ref / out_ref : (Cin, T) / (Cout, T), T = b_tile * length (lane axis).
    w1_ref : (mid, Cin)      b1_ref : (mid, 1)
    w2_ref : (5, mid, mid)   b2_ref : (mid, 1)
    w3_ref : (Cout, mid)     b3_ref : (Cout, 1)
    BN scales are folded into the conv weights in the wrapper.
    """
    t = x_ref.shape[-1]
    x = x_ref[...]                                             # (Cin, T)

    # --- conv1 (1x1, BN folded) + bias + relu: one fat MXU dot ---
    h1 = jnp.dot(w1_ref[...], x, preferred_element_type=jnp.float32)
    h1 = jnp.maximum(h1 + b1_ref[...], 0.0)                    # (mid, T)

    # --- conv2 (k=5, pad=2) + bias + relu ---
    # Batch elements are contiguous length-L lane segments.  Each tap is the
    # whole slab rotated on the lane axis (XLU) and edge-masked so taps never
    # cross segment (= batch) boundaries.  No padded scratch, no misaligned
    # lane slices; roll wrap-around is always masked off.
    lane = jax.lax.broadcasted_iota(jnp.int32, (1, t), 1) % length
    acc = jnp.dot(w2_ref[2], h1, preferred_element_type=jnp.float32)   # s = 0
    for k in (0, 1, 3, 4):                                     # static, tiny
        s = k - 2
        tap = pltpu.roll(h1, shift=(-s) % t, axis=1)           # tap[:,p] = h1[:,p+s]
        valid = jnp.logical_and(lane + s >= 0, lane + s < length)
        acc = acc + jnp.dot(w2_ref[k], jnp.where(valid, tap, 0.0),
                            preferred_element_type=jnp.float32)
    h2 = jnp.maximum(acc + b2_ref[...], 0.0)                   # (mid, T)

    # --- conv3 (1x1) + bias + relu ---
    h3 = jnp.dot(w3_ref[...], h2, preferred_element_type=jnp.float32)
    h3 = jnp.maximum(h3 + b3_ref[...], 0.0)                    # (Cout, T)

    # --- residual add + relu (downsample=None => residual = x): one store ---
    out_ref[...] = jnp.maximum(h3 + x, 0.0)


def _bn_fold(gamma, beta, mean, var, eps=1e-5):
    """Eval-mode BatchNorm1d -> per-channel (scale, bias)."""
    scale = gamma / jnp.sqrt(var + eps)
    return scale, beta - mean * scale


def _vmem_limit_bytes() -> int:
    """Scoped-VMEM limit safely below the physical per-core capacity."""
    try:
        cap = int(pltpu.get_tpu_info().vmem_capacity_bytes)
    except Exception:
        cap = 64 * 1024 * 1024          # v7x per-TC VMEM (smallest generation)
    return min(cap * 3 // 4, 96 * 1024 * 1024)


def _pick_b_tile(n, cin, cout, mid, length, tile_budget_bytes):
    """VMEM-aware batch tile.

    Largest b_tile whose (double-buffered) in/out blocks plus in-kernel
    intermediates fit the budget, preferring lane extents (b_tile*length) that
    are multiples of 128 (unmasked lane-dense stores) and >=2 grid steps when
    possible (feeds both v7x TensorCores).
    """
    # f32 bytes live per batch element per grid step (generous headroom):
    per_b = 4 * length * (2 * (cin + cout) + 12 * mid + 2 * cout)
    max_bt = max(1, int(tile_budget_bytes) // per_b)
    lane_b = 128 // math.gcd(128, length)   # smallest b with (b*length) % 128 == 0
    bt = min(n, max_bt)
    if lane_b <= max_bt:
        bt = max(lane_b, (bt // lane_b) * lane_b)
        if -(-n // bt) < 2 and bt >= 2 * lane_b:
            bt = max(lane_b, (bt // 2) // lane_b * lane_b)
    # TODO(synk): if even bt == 1 exceeds the budget (very long L), tile L with
    # a 2-element halo instead.
    return int(bt)


@jax.jit
def bottleneck_forward(x_ncl, params):
    """x_ncl: (N, Cin, L) float32, Cin == 4 * midplane, stride == 1."""
    n, cin, length = x_ncl.shape
    mid = params["w1"].shape[0]
    cout = 4 * mid
    assert cin == cout, "identity residual requires inplane == 4*midplane"

    # Fold BN scale into the conv weights; only bias + relu stay in-kernel.
    s1, b1 = _bn_fold(params["g1"], params["be1"], params["m1"], params["v1"])
    s2, b2 = _bn_fold(params["g2"], params["be2"], params["m2"], params["v2"])
    s3, b3 = _bn_fold(params["g3"], params["be3"], params["m3"], params["v3"])

    w1 = params["w1"][:, :, 0] * s1[:, None]                          # (mid, Cin)
    w2 = jnp.transpose(params["w2"] * s2[:, None, None], (2, 0, 1))   # (5, mid, mid)
    w3 = params["w3"][:, :, 0] * s3[:, None]                          # (Cout, mid)
    b1c, b2c, b3c = b1[:, None], b2[:, None], b3[:, None]

    vmem_limit = _vmem_limit_bytes()
    bt = _pick_b_tile(n, cin, cout, mid, length, vmem_limit // 2)
    n_pad = -(-n // bt) * bt
    t = bt * length

    # Lane-major slab: channels on sublanes, (batch*length) on lanes.  Pure
    # layout plumbing in the wrapper; gives lane-dense loads/stores in-kernel.
    xp = jnp.pad(x_ncl, ((0, n_pad - n), (0, 0), (0, 0))) if n_pad != n else x_ncl
    x2d = jnp.transpose(xp, (1, 0, 2)).reshape(cin, n_pad * length)

    def resident(a):            # weights/biases: DMA'd once, stay resident
        return pl.BlockSpec(a.shape, lambda i, nd=a.ndim: (0,) * nd)

    out2d = pl.pallas_call(
        functools.partial(_bottleneck_kernel, length=length),
        out_shape=jax.ShapeDtypeStruct((cout, n_pad * length), jnp.float32),
        grid=(n_pad // bt,),
        in_specs=[
            pl.BlockSpec((cin, t), lambda i: (0, i)),                  # x slab
            resident(w1), resident(b1c),
            resident(w2), resident(b2c),
            resident(w3), resident(b3c),
        ],
        out_specs=pl.BlockSpec((cout, t), lambda i: (0, i)),
        compiler_params=pltpu.CompilerParams(
            dimension_semantics=("parallel",),
            vmem_limit_bytes=vmem_limit),
    )(x2d, w1, b1c, w2, b2c, w3, b3c)

    out = jnp.transpose(out2d.reshape(cout, n_pad, length), (1, 0, 2))
    return out[:n] if n_pad != n else out                              # (N, Cout, L)


def _reference_forward(x_ncl, params):
    """Pure-JAX reference (mirrors the PyTorch forward, eval-mode BN)."""
    def bn(y, g, be, m, v, eps=1e-5):
        s = g / jnp.sqrt(v + eps)
        return y * s[None, :, None] + (be - m * s)[None, :, None]

    dn = ("NCH", "OIH", "NCH")
    h = jax.lax.conv_general_dilated(x_ncl, params["w1"], (1,), "VALID",
                                     dimension_numbers=dn)
    h = jax.nn.relu(bn(h, params["g1"], params["be1"], params["m1"], params["v1"]))
    h = jax.lax.conv_general_dilated(h, params["w2"], (1,), [(2, 2)],
                                     dimension_numbers=dn)
    h = jax.nn.relu(bn(h, params["g2"], params["be2"], params["m2"], params["v2"]))
    h = jax.lax.conv_general_dilated(h, params["w3"], (1,), "VALID",
                                     dimension_numbers=dn)
    h = jax.nn.relu(bn(h, params["g3"], params["be3"], params["m3"], params["v3"]))
    return jax.nn.relu(h + x_ncl)


if __name__ == "__main__":
    key = jax.random.PRNGKey(0)
    midplane = 4
    inplane = 4 * midplane        # identity residual => inplane == 4 * midplane
    batch, length = 2, 16

    ks = jax.random.split(key, 16)
    params = {
        # conv weights (PyTorch layout: (out, in, k)), bias=False
        "w1": 0.1 * jax.random.normal(ks[0], (midplane, inplane, 1), jnp.float32),
        "w2": 0.1 * jax.random.normal(ks[1], (midplane, midplane, 5), jnp.float32),
        "w3": 0.1 * jax.random.normal(ks[2], (4 * midplane, midplane, 1), jnp.float32),
        # BatchNorm1d params (eval mode): gamma, beta, running_mean, running_var
        "g1": 1.0 + 0.1 * jax.random.normal(ks[3], (midplane,), jnp.float32),
        "be1": 0.1 * jax.random.normal(ks[4], (midplane,), jnp.float32),
        "m1": 0.1 * jax.random.normal(ks[5], (midplane,), jnp.float32),
        "v1": 1.0 + 0.1 * jax.random.uniform(ks[6], (midplane,), jnp.float32),
        "g2": 1.0 + 0.1 * jax.random.normal(ks[7], (midplane,), jnp.float32),
        "be2": 0.1 * jax.random.normal(ks[8], (midplane,), jnp.float32),
        "m2": 0.1 * jax.random.normal(ks[9], (midplane,), jnp.float32),
        "v2": 1.0 + 0.1 * jax.random.uniform(ks[10], (midplane,), jnp.float32),
        "g3": 1.0 + 0.1 * jax.random.normal(ks[11], (4 * midplane,), jnp.float32),
        "be3": 0.1 * jax.random.normal(ks[12], (4 * midplane,), jnp.float32),
        "m3": 0.1 * jax.random.normal(ks[13], (4 * midplane,), jnp.float32),
        "v3": 1.0 + 0.1 * jax.random.uniform(ks[14], (4 * midplane,), jnp.float32),
    }

    x = jax.random.normal(ks[15], (batch, inplane, length), jnp.float32)

    out = jax.block_until_ready(bottleneck_forward(x, params))
    ref = jax.block_until_ready(_reference_forward(x, params))

    assert out.shape == (batch, 4 * midplane, length)
    assert jnp.allclose(out, ref, atol=2e-4, rtol=2e-4), "mismatch vs JAX reference"

    print("KERNEL_OK")
</pallas_src>

<mosaic_0001>
module attributes {stable_mosaic.version = 11 : i64} {
  func.func @_bottleneck_kernel(%arg0: i32, %arg1: memref<16x128xf32, #tpu.memory_space<vmem>>, %arg2: memref<4x16xf32, #tpu.memory_space<vmem>>, %arg3: memref<4x1xf32, #tpu.memory_space<vmem>>, %arg4: memref<5x4x4xf32, #tpu.memory_space<vmem>>, %arg5: memref<4x1xf32, #tpu.memory_space<vmem>>, %arg6: memref<16x4xf32, #tpu.memory_space<vmem>>, %arg7: memref<16x1xf32, #tpu.memory_space<vmem>>, %arg8: memref<16x128xf32, #tpu.memory_space<vmem>>) attributes {dimension_semantics = [#tpu.dimension_semantics<parallel>], iteration_bounds = array<i64: 1>, scalar_prefetch = 0 : i64, scratch_operands = 0 : i64, tpu.core_type = #tpu.core_type<tc>, window_params = [{transform_indices = @transform_0, window_bounds = array<i64: 16, 128>}, {pipeline_mode = #tpu.pipeline_mode<synchronous>, transform_indices = @transform_1, window_bounds = array<i64: 4, 16>}, {pipeline_mode = #tpu.pipeline_mode<synchronous>, transform_indices = @transform_2, window_bounds = array<i64: 4, 1>}, {pipeline_mode = #tpu.pipeline_mode<synchronous>, transform_indices = @transform_3, window_bounds = array<i64: 5, 4, 4>}, {pipeline_mode = #tpu.pipeline_mode<synchronous>, transform_indices = @transform_4, window_bounds = array<i64: 4, 1>}, {pipeline_mode = #tpu.pipeline_mode<synchronous>, transform_indices = @transform_5, window_bounds = array<i64: 16, 4>}, {pipeline_mode = #tpu.pipeline_mode<synchronous>, transform_indices = @transform_6, window_bounds = array<i64: 16, 1>}, {transform_indices = @transform_7, window_bounds = array<i64: 16, 128>}]} {
    %c0 = arith.constant 0 : index
    %c0_0 = arith.constant 0 : index
    %0 = vector.load %arg1[%c0, %c0_0] : memref<16x128xf32, #tpu.memory_space<vmem>>, vector<16x128xf32>
    %c0_1 = arith.constant 0 : index
    %c0_2 = arith.constant 0 : index
    %1 = vector.load %arg2[%c0_1, %c0_2] : memref<4x16xf32, #tpu.memory_space<vmem>>, vector<4x16xf32>
    %cst = arith.constant dense<0.000000e+00> : vector<4x128xf32>
    %2 = tpu.matmul %1, %0, %cst {dimension_numbers = #tpu.dot_dimension_numbers<[1], [0], [0], [1], [0, 0, 1, 1], [], []>} : vector<4x16xf32>, vector<16x128xf32>, vector<4x128xf32> -> vector<4x128xf32>
    %c0_3 = arith.constant 0 : index
    %c0_4 = arith.constant 0 : index
    %3 = vector.load %arg3[%c0_3, %c0_4] : memref<4x1xf32, #tpu.memory_space<vmem>>, vector<4x1xf32>
    %4 = vector.broadcast %3 : vector<4x1xf32> to vector<4x128xf32>
    %5 = arith.addf %2, %4 : vector<4x128xf32>
    %cst_5 = arith.constant 0.000000e+00 : f32
    %6 = vector.broadcast %cst_5 : f32 to vector<4x128xf32>
    %7 = arith.maximumf %5, %6 : vector<4x128xf32>
    %8 = tpu.iota {dimensions = array<i32: 1>} : vector<1x128xi32>
    %c16_i32 = arith.constant 16 : i32
    %c0_i32 = arith.constant 0 : i32
    %9 = arith.cmpi eq, %c16_i32, %c0_i32 : i32
    %c1_i32 = arith.constant 1 : i32
    %10 = arith.select %9, %c1_i32, %c16_i32 : i32
    %11 = vector.broadcast %10 : i32 to vector<1x128xi32>
    %12 = arith.remsi %8, %11 : vector<1x128xi32>
    %c0_i32_6 = arith.constant 0 : i32
    %13 = vector.broadcast %c0_i32_6 : i32 to vector<1x128xi32>
    %14 = arith.cmpi ne, %12, %13 : vector<1x128xi32>
    %c0_i32_7 = arith.constant 0 : i32
    %15 = vector.broadcast %c0_i32_7 : i32 to vector<1x128xi32>
    %16 = arith.cmpi slt, %12, %15 : vector<1x128xi32>
    %c0_i32_8 = arith.constant 0 : i32
    %17 = arith.cmpi slt, %10, %c0_i32_8 : i32
    %18 = vector.broadcast %17 : i1 to vector<1x128xi1>
    %19 = vector.broadcast %18 : vector<1x128xi1> to vector<1x128xi1>
    %20 = arith.xori %16, %19 : vector<1x128xi1>
    %21 = arith.andi %20, %14 : vector<1x128xi1>
    %22 = vector.broadcast %10 : i32 to vector<1x128xi32>
    %23 = arith.addi %12, %22 : vector<1x128xi32>
    %24 = arith.select %21, %23, %12 : vector<1x128xi1>, vector<1x128xi32>
    %c2 = arith.constant 2 : index
    %c0_9 = arith.constant 0 : index
    %c0_10 = arith.constant 0 : index
    %25 = vector.load %arg4[%c2, %c0_9, %c0_10] : memref<5x4x4xf32, #tpu.memory_space<vmem>>, vector<1x4x4xf32>
    %26 = vector.shape_cast %25 : vector<1x4x4xf32> to vector<4x4xf32>
    %cst_11 = arith.constant dense<0.000000e+00> : vector<4x128xf32>
    %27 = tpu.matmul %26, %7, %cst_11 {dimension_numbers = #tpu.dot_dimension_numbers<[1], [0], [0], [1], [0, 0, 1, 1], [], []>} : vector<4x4xf32>, vector<4x128xf32>, vector<4x128xf32> -> vector<4x128xf32>
    %c2_i32 = arith.constant 2 : i32
    %28 = tpu.dynamic_rotate %7 by %c2_i32 dim 1 : vector<4x128xf32>, i32 -> vector<4x128xf32>
    %c-2_i32 = arith.constant -2 : i32
    %29 = vector.broadcast %c-2_i32 : i32 to vector<1x128xi32>
    %30 = arith.addi %24, %29 : vector<1x128xi32>
    %c0_i32_12 = arith.constant 0 : i32
    %31 = vector.broadcast %c0_i32_12 : i32 to vector<1x128xi32>
    %32 = arith.cmpi sge, %30, %31 : vector<1x128xi32>
    %c-2_i32_13 = arith.constant -2 : i32
    %33 = vector.broadcast %c-2_i32_13 : i32 to vector<1x128xi32>
    %34 = arith.addi %24, %33 : vector<1x128xi32>
    %c16_i32_14 = arith.constant 16 : i32
    %35 = vector.broadcast %c16_i32_14 : i32 to vector<1x128xi32>
    %36 = arith.cmpi slt, %34, %35 : vector<1x128xi32>
    %37 = arith.andi %32, %36 : vector<1x128xi1>
    %c0_15 = arith.constant 0 : index
    %c0_16 = arith.constant 0 : index
    %c0_17 = arith.constant 0 : index
    %38 = vector.load %arg4[%c0_15, %c0_16, %c0_17] : memref<5x4x4xf32, #tpu.memory_space<vmem>>, vector<1x4x4xf32>
    %39 = vector.shape_cast %38 : vector<1x4x4xf32> to vector<4x4xf32>
    %cst_18 = arith.constant 0.000000e+00 : f32
    %40 = vector.shape_cast %37 : vector<1x128xi1> to vector<1x128xi1>
    %41 = vector.broadcast %40 : vector<1x128xi1> to vector<4x128xi1>
    %42 = vector.broadcast %cst_18 : f32 to vector<4x128xf32>
    %43 = arith.select %41, %28, %42 : vector<4x128xi1>, vector<4x128xf32>
    %cst_19 = arith.constant dense<0.000000e+00> : vector<4x128xf32>
    %44 = tpu.matmul %39, %43, %cst_19 {dimension_numbers = #tpu.dot_dimension_numbers<[1], [0], [0], [1], [0, 0, 1, 1], [], []>} : vector<4x4xf32>, vector<4x128xf32>, vector<4x128xf32> -> vector<4x128xf32>
    %45 = arith.addf %27, %44 : vector<4x128xf32>
    %c1_i32_20 = arith.constant 1 : i32
    %46 = tpu.dynamic_rotate %7 by %c1_i32_20 dim 1 : vector<4x128xf32>, i32 -> vector<4x128xf32>
    %c-1_i32 = arith.constant -1 : i32
    %47 = vector.broadcast %c-1_i32 : i32 to vector<1x128xi32>
    %48 = arith.addi %24, %47 : vector<1x128xi32>
    %c0_i32_21 = arith.constant 0 : i32
    %49 = vector.broadcast %c0_i32_21 : i32 to vector<1x128xi32>
    %50 = arith.cmpi sge, %48, %49 : vector<1x128xi32>
    %c-1_i32_22 = arith.constant -1 : i32
    %51 = vector.broadcast %c-1_i32_22 : i32 to vector<1x128xi32>
    %52 = arith.addi %24, %51 : vector<1x128xi32>
    %c16_i32_23 = arith.constant 16 : i32
    %53 = vector.broadcast %c16_i32_23 : i32 to vector<1x128xi32>
    %54 = arith.cmpi slt, %52, %53 : vector<1x128xi32>
    %55 = arith.andi %50, %54 : vector<1x128xi1>
    %c1 = arith.constant 1 : index
    %c0_24 = arith.constant 0 : index
    %c0_25 = arith.constant 0 : index
    %56 = vector.load %arg4[%c1, %c0_24, %c0_25] : memref<5x4x4xf32, #tpu.memory_space<vmem>>, vector<1x4x4xf32>
    %57 = vector.shape_cast %56 : vector<1x4x4xf32> to vector<4x4xf32>
    %cst_26 = arith.constant 0.000000e+00 : f32
    %58 = vector.shape_cast %55 : vector<1x128xi1> to vector<1x128xi1>
    %59 = vector.broadcast %58 : vector<1x128xi1> to vector<4x128xi1>
    %60 = vector.broadcast %cst_26 : f32 to vector<4x128xf32>
    %61 = arith.select %59, %46, %60 : vector<4x128xi1>, vector<4x128xf32>
    %cst_27 = arith.constant dense<0.000000e+00> : vector<4x128xf32>
    %62 = tpu.matmul %57, %61, %cst_27 {dimension_numbers = #tpu.dot_dimension_numbers<[1], [0], [0], [1], [0, 0, 1, 1], [], []>} : vector<4x4xf32>, vector<4x128xf32>, vector<4x128xf32> -> vector<4x128xf32>
    %63 = arith.addf %45, %62 : vector<4x128xf32>
    %c127_i32 = arith.constant 127 : i32
    %64 = tpu.dynamic_rotate %7 by %c127_i32 dim 1 : vector<4x128xf32>, i32 -> vector<4x128xf32>
    %c1_i32_28 = arith.constant 1 : i32
    %65 = vector.broadcast %c1_i32_28 : i32 to vector<1x128xi32>
    %66 = arith.addi %24, %65 : vector<1x128xi32>
    %c0_i32_29 = arith.constant 0 : i32
    %67 = vector.broadcast %c0_i32_29 : i32 to vector<1x128xi32>
    %68 = arith.cmpi sge, %66, %67 : vector<1x128xi32>
    %c1_i32_30 = arith.constant 1 : i32
    %69 = vector.broadcast %c1_i32_30 : i32 to vector<1x128xi32>
    %70 = arith.addi %24, %69 : vector<1x128xi32>
    %c16_i32_31 = arith.constant 16 : i32
    %71 = vector.broadcast %c16_i32_31 : i32 to vector<1x128xi32>
    %72 = arith.cmpi slt, %70, %71 : vector<1x128xi32>
    %73 = arith.andi %68, %72 : vector<1x128xi1>
    %c3 = arith.constant 3 : index
    %c0_32 = arith.constant 0 : index
    %c0_33 = arith.constant 0 : index
    %74 = vector.load %arg4[%c3, %c0_32, %c0_33] : memref<5x4x4xf32, #tpu.memory_space<vmem>>, vector<1x4x4xf32>
    %75 = vector.shape_cast %74 : vector<1x4x4xf32> to vector<4x4xf32>
    %cst_34 = arith.constant 0.000000e+00 : f32
    %76 = vector.shape_cast %73 : vector<1x128xi1> to vector<1x128xi1>
    %77 = vector.broadcast %76 : vector<1x128xi1> to vector<4x128xi1>
    %78 = vector.broadcast %cst_34 : f32 to vector<4x128xf32>
    %79 = arith.select %77, %64, %78 : vector<4x128xi1>, vector<4x128xf32>
    %cst_35 = arith.constant dense<0.000000e+00> : vector<4x128xf32>
    %80 = tpu.matmul %75, %79, %cst_35 {dimension_numbers = #tpu.dot_dimension_numbers<[1], [0], [0], [1], [0, 0, 1, 1], [], []>} : vector<4x4xf32>, vector<4x128xf32>, vector<4x128xf32> -> vector<4x128xf32>
    %81 = arith.addf %63, %80 : vector<4x128xf32>
    %c126_i32 = arith.constant 126 : i32
    %82 = tpu.dynamic_rotate %7 by %c126_i32 dim 1 : vector<4x128xf32>, i32 -> vector<4x128xf32>
    %c2_i32_36 = arith.constant 2 : i32
    %83 = vector.broadcast %c2_i32_36 : i32 to vector<1x128xi32>
    %84 = arith.addi %24, %83 : vector<1x128xi32>
    %c0_i32_37 = arith.constant 0 : i32
    %85 = vector.broadcast %c0_i32_37 : i32 to vector<1x128xi32>
    %86 = arith.cmpi sge, %84, %85 : vector<1x128xi32>
    %c2_i32_38 = arith.constant 2 : i32
    %87 = vector.broadcast %c2_i32_38 : i32 to vector<1x128xi32>
    %88 = arith.addi %24, %87 : vector<1x128xi32>
    %c16_i32_39 = arith.constant 16 : i32
    %89 = vector.broadcast %c16_i32_39 : i32 to vector<1x128xi32>
    %90 = arith.cmpi slt, %88, %89 : vector<1x128xi32>
    %91 = arith.andi %86, %90 : vector<1x128xi1>
    %c4 = arith.constant 4 : index
    %c0_40 = arith.constant 0 : index
    %c0_41 = arith.constant 0 : index
    %92 = vector.load %arg4[%c4, %c0_40, %c0_41] : memref<5x4x4xf32, #tpu.memory_space<vmem>>, vector<1x4x4xf32>
    %93 = vector.shape_cast %92 : vector<1x4x4xf32> to vector<4x4xf32>
    %cst_42 = arith.constant 0.000000e+00 : f32
    %94 = vector.shape_cast %91 : vector<1x128xi1> to vector<1x128xi1>
    %95 = vector.broadcast %94 : vector<1x128xi1> to vector<4x128xi1>
    %96 = vector.broadcast %cst_42 : f32 to vector<4x128xf32>
    %97 = arith.select %95, %82, %96 : vector<4x128xi1>, vector<4x128xf32>
    %cst_43 = arith.constant dense<0.000000e+00> : vector<4x128xf32>
    %98 = tpu.matmul %93, %97, %cst_43 {dimension_numbers = #tpu.dot_dimension_numbers<[1], [0], [0], [1], [0, 0, 1, 1], [], []>} : vector<4x4xf32>, vector<4x128xf32>, vector<4x128xf32> -> vector<4x128xf32>
    %99 = arith.addf %81, %98 : vector<4x128xf32>
    %c0_44 = arith.constant 0 : index
    %c0_45 = arith.constant 0 : index
    %100 = vector.load %arg5[%c0_44, %c0_45] : memref<4x1xf32, #tpu.memory_space<vmem>>, vector<4x1xf32>
    %101 = vector.broadcast %100 : vector<4x1xf32> to vector<4x128xf32>
    %102 = arith.addf %99, %101 : vector<4x128xf32>
    %cst_46 = arith.constant 0.000000e+00 : f32
    %103 = vector.broadcast %cst_46 : f32 to vector<4x128xf32>
    %104 = arith.maximumf %102, %103 : vector<4x128xf32>
    %c0_47 = arith.constant 0 : index
    %c0_48 = arith.constant 0 : index
    %105 = vector.load %arg6[%c0_47, %c0_48] : memref<16x4xf32, #tpu.memory_space<vmem>>, vector<16x4xf32>
    %cst_49 = arith.constant dense<0.000000e+00> : vector<16x128xf32>
    %106 = tpu.matmul %105, %104, %cst_49 {dimension_numbers = #tpu.dot_dimension_numbers<[1], [0], [0], [1], [0, 0, 1, 1], [], []>} : vector<16x4xf32>, vector<4x128xf32>, vector<16x128xf32> -> vector<16x128xf32>
    %c0_50 = arith.constant 0 : index
    %c0_51 = arith.constant 0 : index
    %107 = vector.load %arg7[%c0_50, %c0_51] : memref<16x1xf32, #tpu.memory_space<vmem>>, vector<16x1xf32>
    %108 = vector.broadcast %107 : vector<16x1xf32> to vector<16x128xf32>
    %109 = arith.addf %106, %108 : vector<16x128xf32>
    %cst_52 = arith.constant 0.000000e+00 : f32
    %110 = vector.broadcast %cst_52 : f32 to vector<16x128xf32>
    %111 = arith.maximumf %109, %110 : vector<16x128xf32>
    %112 = arith.addf %111, %0 : vector<16x128xf32>
    %cst_53 = arith.constant 0.000000e+00 : f32
    %113 = vector.broadcast %cst_53 : f32 to vector<16x128xf32>
    %114 = arith.maximumf %112, %113 : vector<16x128xf32>
    %c0_54 = arith.constant 0 : index
    %c0_55 = arith.constant 0 : index
    %115 = vector.load %arg8[%c0_54, %c0_55] : memref<16x128xf32, #tpu.memory_space<vmem>>, vector<16x128xf32>
    tpu.vector_store %arg8[%c0_54, %c0_55], %114 {strides = array<i32>} : memref<16x128xf32, #tpu.memory_space<vmem>>, vector<16x128xf32>,
    return
  }
  func.func @transform_0(%arg0: i32) -> (i32, i32) {
    %c0_i32 = arith.constant 0 : i32
    %c0_i32_0 = arith.constant 0 : i32
    return %c0_i32, %arg0 : i32, i32
  }
  func.func @transform_1(%arg0: i32) -> (i32, i32) {
    %c0_i32 = arith.constant 0 : i32
    %c0_i32_0 = arith.constant 0 : i32
    %c0_i32_1 = arith.constant 0 : i32
    return %c0_i32, %c0_i32_0 : i32, i32
  }
  func.func @transform_2(%arg0: i32) -> (i32, i32) {
    %c0_i32 = arith.constant 0 : i32
    %c0_i32_0 = arith.constant 0 : i32
    %c0_i32_1 = arith.constant 0 : i32
    return %c0_i32, %c0_i32_0 : i32, i32
  }
  func.func @transform_3(%arg0: i32) -> (i32, i32, i32) {
    %c0_i32 = arith.constant 0 : i32
    %c0_i32_0 = arith.constant 0 : i32
    %c0_i32_1 = arith.constant 0 : i32
    %c0_i32_2 = arith.constant 0 : i32
    return %c0_i32, %c0_i32_0, %c0_i32_1 : i32, i32, i32
  }
  func.func @transform_4(%arg0: i32) -> (i32, i32) {
    %c0_i32 = arith.constant 0 : i32
    %c0_i32_0 = arith.constant 0 : i32
    %c0_i32_1 = arith.constant 0 : i32
    return %c0_i32, %c0_i32_0 : i32, i32
  }
  func.func @transform_5(%arg0: i32) -> (i32, i32) {
    %c0_i32 = arith.constant 0 : i32
    %c0_i32_0 = arith.constant 0 : i32
    %c0_i32_1 = arith.constant 0 : i32
    return %c0_i32, %c0_i32_0 : i32, i32
  }
  func.func @transform_6(%arg0: i32) -> (i32, i32) {
    %c0_i32 = arith.constant 0 : i32
    %c0_i32_0 = arith.constant 0 : i32
    %c0_i32_1 = arith.constant 0 : i32
    return %c0_i32, %c0_i32_0 : i32, i32
  }
  func.func @transform_7(%arg0: i32) -> (i32, i32) {
    %c0_i32 = arith.constant 0 : i32
    %c0_i32_0 = arith.constant 0 : i32
    return %c0_i32, %arg0 : i32, i32
  }
}

</mosaic_0001>

<bundles_post_ra>
// kernel: bottleneck_forward.1
= control target key start
LH: loop header
LB: loop body
LE: loop exit
PB: predicated region body
PF: predicated region fallthrough
CT: control target
= control target key end

     0   :  { %v756_v0 = vmov 0.0|0.0   ;;  %vm757_vm0 = vmmov 0   ;;  %v758_v3 = vmov 0.0   ;;  %v759_v5 = vmov 0   ;;  %s761_s8 = smov 2   ;;  %s762_s9 = smov 127   ;;  %s891_s0 = inlined_call_operand.vmem [shape: f32[16,128], index: 0, kind: input, shape index: {}]   ;;  %s892_s2 = inlined_call_operand.vmem [shape: f32[4,1], index: 2, kind: input, shape index: {}]   ;;  %s893_s1 = inlined_call_operand.vmem [shape: f32[4,16], index: 1, kind: input, shape index: {}]   ;;  %s894_s6 = inlined_call_operand.vmem [shape: f32[16,1], index: 6, kind: input, shape index: {}]   ;;  %s895_s4 = inlined_call_operand.vmem [shape: f32[4,1], index: 4, kind: input, shape index: {}]   ;;  %s896_s3 = inlined_call_operand.vmem [shape: f32[5,4,4], index: 3, kind: input, shape index: {}]   ;;  %s897_s5 = inlined_call_operand.vmem [shape: f32[16,4], index: 5, kind: input, shape index: {}]   ;;  %s898_s7 = inlined_call_operand.vmem [shape: f32[16,128], index: 7, kind: output, shape index: {}]  }
   0x1   :  { %743 = vmatprep.subr.bf16.mxu0 %v756_v0  ;;  %v807_v1 = vld [vmem:[%s891_s0] sm:$0xff]  ;;  %v812_v2 = vld [vmem:[%s891_s0 + $0x8] sm:$0xff]  ;;  %710 = vmatprep.mubr.msk.f32.mxu0 %vm757_vm0, %v758_v3  ;;  %vm35_vm1 = vcmask 130048   ;;  %v110_v16 = vlaneseq  ;;  %vm140_vm4 = vcmask 1043456   ;;  %vm136_vm5 = vcmask 31744  }
   0x2   :  { %v744_v4 = vpack.c.bf16 %v812_v2, %v807_v1  ;;  %754 = vset.pattern.permute.xlu0 %v759_v5  ;;  %v29_v6 = vld [vmem:[%s892_s2] sm:$0xf]  ;;  %713 = vmatprep.subr.mxu1 %v758_v3  ;;  %s760_s2 = smov 1   ;;  %v565_v15 = vld [vmem:[%s894_s6 + $0x8] sm:$0xff]  ;;  %v678_v28 = vld [vmem:[%s896_s3 + $0x4] sm:$0xf] }
   0x3   :  { %32 = vperm.xlu0 %754, %v29_v6   ;;  %715 = vmatprep.mubr.msk.f32.mxu1 %vm757_vm0, %v758_v3  ;;  %v28_v7 = vld [vmem:[%s893_s1] sm:$0xf]  ;;  %s763_s1 = smov 126   ;;  %v111_v17 = vand.u32 127, %v110_v16  ;;  %v673_v31 = vld [vmem:[%s896_s3 + $0x8] sm:$0xf] }
   0x4   :  { %745 = vmatpush3.bf16.msra.mxu0 %v744_v4  ;;  %755 = vset.pattern.permute.xlu1 %v759_v5  ;;  %v564_v13 = vld [vmem:[%s894_s6] sm:$0xff]  ;;  %v684_v34 = vld [vmem:[%s896_s3 + $0x10] sm:$0xf]  ;;  %v681_v35 = vld [vmem:[%s896_s3 + $0xc] sm:$0xf] }
   0x5   :  { %723 = vmatprep.subr.mxu0 %v758_v3  ;;  %v554_v14 = vld [vmem:[%s895_s4] sm:$0xf]  ;;  %v116_v18 = vand.u32 15, %v111_v17  ;;  %v563_v54 = vld [vmem:[%s897_s5 + $0x8] sm:$0xff] }
   0x6   :  { %v132_v25 = vld [vmem:[%s896_s3] sm:$0xf] }
   0x7   :  { %711 = vmatmul.mubr.msk.f32.vlgmr.msra.gmra.mrb[0].mxu0 %vm35_vm1, %v28_v7  ;;  %v292_v19 = vadd.s32 4294967295, %v116_v18  ;;  %v128_v20 = vadd.s32 4294967294, %v116_v18  ;;  %v380_v21 = vadd.s32 1, %v116_v18  ;;  %v468_v22 = vadd.s32 2, %v116_v18  ;;  %v562_v36 = vld [vmem:[%s897_s5] sm:$0xff] }
   0x8   :  { %725 = vmatprep.mubr.msk.f32.mxu0 %vm757_vm0, %v758_v3 }
   0x9   :  { %vm293_vm2 = vcmp.ge.s32.totalorder %v292_v19, 0  ;;  %vm129_vm3 = vcmp.ge.s32.totalorder %v128_v20, 0  ;;  %vm382_vm6 = vcmp.lt.s32.totalorder %v380_v21, 16  ;;  %vm470_vm7 = vcmp.lt.s32.totalorder %v468_v22, 16 }
  0x82   :  { %v33_v8 = vpop.permute.xlu0 %32 }
  0xda   :  { %v105_v9 = vpop.f32.mrb[0].mxu0 }
  0xdb   :  { %v106_v10 = vadd.f32 %v105_v9, %v33_v8  ;;  %v712_v11 = vpop.f32.mrb[1].mxu0 }
  0xdd   :  { %v109_v12 = vmax.f32 %v106_v10, 0.0 }
  0xdf   :  { %290 = vrot.lane.b32.xlu1 %v109_v12, %s760_s2  ;;  %126 = vrot.lane.b32.xlu0 %v109_v12, %s761_s8 }
  0xe3   :  { %378 = vrot.lane.b32.xlu1 %v109_v12, %s762_s9  ;;  %466 = vrot.lane.b32.xlu0 %v109_v12, %s763_s1 }
  0xe7   :  { %568 = vperm.xlu0 %754, %v564_v13   ;;  %557 = vperm.xlu1 %755, %v554_v14  }
  0xeb   :  { %573 = vperm.xlu1 %755, %v565_v15  }
 0x151   :  { %v291_v23 = vpop.permute.xlu1 %290  ;;  %v127_v24 = vpop.permute.xlu0 %126 }
 0x152   :  { %v300_v26 = vsel %vm293_vm2, %v291_v23, 0.0  ;;  %v135_v27 = vsel %vm129_vm3, %v127_v24, 0.0 }
 0x153   :  { %714 = vmatpush3.msk.msra.mxu1 %vm140_vm4, %v135_v27  ;;  %724 = vmatpush3.msk.msra.mxu0 %vm140_vm4, %v300_v26 }
 0x154   :  { %716 = vmatmul.mubr.msk.f32.vlgmr.msra.gmra.mrb[0].mxu1 %vm136_vm5, %v132_v25  ;;  %718 = vmatprep.subr.mxu1 %v758_v3 }
 0x155   :  { %v379_v29 = vpop.permute.xlu1 %378  ;;  %719 = vmatpush3.msk.msra.mxu1 %vm140_vm4, %v109_v12  ;;  %v467_v30 = vpop.permute.xlu0 %466  ;;  %733 = vmatprep.subr.mxu0 %v758_v3 }
 0x156   :  { %v388_v32 = vsel %vm382_vm6, %v379_v29, 0.0  ;;  %v476_v33 = vsel %vm470_vm7, %v467_v30, 0.0  ;;  %720 = vmatprep.mubr.msk.f32.mxu1 %vm757_vm0, %v758_v3  ;;  %726 = vmatmul.mubr.msk.f32.vlgmr.msra.gmra.mrb[2].mxu0 %vm136_vm5, %v678_v28 }
 0x157   :  { %728 = vmatprep.subr.mxu1 %v758_v3  ;;  %734 = vmatpush3.msk.msra.mxu0 %vm140_vm4, %v476_v33 }
 0x158   :  { %721 = vmatmul.mubr.msk.f32.vlgmr.msra.gmra.mrb[2].mxu1 %vm136_vm5, %v673_v31  ;;  %735 = vmatprep.mubr.msk.f32.mxu0 %vm757_vm0, %v758_v3 }
 0x159   :  { %729 = vmatpush3.msk.msra.mxu1 %vm140_vm4, %v388_v32  ;;  %730 = vmatprep.mubr.msk.f32.mxu1 %vm757_vm0, %v758_v3 }
 0x15a   :  { %736 = vmatmul.mubr.msk.f32.vlgmr.msra.gmra.mrb[4].mxu0 %vm136_vm5, %v684_v34 }
 0x15c   :  { %731 = vmatmul.mubr.msk.f32.vlgmr.msra.gmra.mrb[4].mxu1 %vm136_vm5, %v681_v35 }
 0x15d   :  { %740 = vmatprep.mubr.msk.f32.mxu1 %vm136_vm5, %v562_v36 }
 0x166   :  { %v558_v51 = vpop.permute.xlu1 %557  ;;  %v569_v57 = vpop.permute.xlu0 %568 }
 0x16a   :  { %v574_v55 = vpop.permute.xlu1 %573 }
 0x227   :  { %v210_v37 = vpop.f32.mrb[0].mxu1 }
 0x228   :  { %v717_v38 = vpop.f32.mrb[1].mxu1 }
 0x229   :  { %v373_v39 = vpop.f32.mrb[2].mxu0 }
 0x22a   :  { %v727_v40 = vpop.f32.mrb[3].mxu0 }
 0x22b   :  { %v286_v41 = vpop.f32.mrb[2].mxu1 }
 0x22c   :  { %v287_v42 = vadd.f32 %v286_v41, %v210_v37  ;;  %v722_v43 = vpop.f32.mrb[3].mxu1 }
 0x22d   :  { %v549_v44 = vpop.f32.mrb[4].mxu0 }
 0x22e   :  { %v377_v45 = vadd.f32 %v373_v39, %v287_v42  ;;  %v737_v46 = vpop.f32.mrb[5].mxu0 }
 0x22f   :  { %v461_v47 = vpop.f32.mrb[4].mxu1 }
 0x230   :  { %v465_v48 = vadd.f32 %v461_v47, %v377_v45  ;;  %v732_v49 = vpop.f32.mrb[5].mxu1 }
 0x232   :  { %v553_v50 = vadd.f32 %v549_v44, %v465_v48 }
 0x234   :  { %v560_v52 = vadd.f32 %v558_v51, %v553_v50 }
 0x236   :  { %v561_v53 = vmax.f32 %v560_v52, 0.0 }
 0x238   :  { %738 = vmatprep.subr.msk.mxu1 %vm140_vm4, %v561_v53 }
 0x239   :  { %739 = vmatpush3.msk.msra.mxu1 %vm140_vm4, %v561_v53 }
 0x23a   :  { %741 = vmatmul.mubr.msk.f32.vlgmr.msra.gmra.mrb[6].mxu1 %vm136_vm5, %v563_v54 }
 0x30d   :  { %v742_v56 = vpop.f32.mrb[6].mxu1 }
 0x30e   :  { %v657_v58 = vadd.f32 %v742_v56, %v574_v55  ;;  %v651_v59 = vpop.f32.mrb[7].mxu1 }
 0x30f   :  { %v652_v60 = vadd.f32 %v651_v59, %v569_v57 }
 0x310   :  { %v661_v61 = vmax.f32 %v657_v58, 0.0 }
 0x311   :  { %v660_v62 = vmax.f32 %v652_v60, 0.0 }
 0x312   :  { %v663_v63 = vadd.f32 %v661_v61, %v812_v2 }
 0x313   :  { %v662_v0 = vadd.f32 %v660_v62, %v807_v1 }
 0x314   :  { %v665_v3 = vmax.f32 %v663_v63, 0.0 }
 0x315   :  { %v664_v4 = vmax.f32 %v662_v0, 0.0 }
 0x316   :  { %667 = vst [vmem:[%s898_s7 + $0x8] sm:$0xff] %v665_v3 }
 0x317   :  { %666 = vst [vmem:[%s898_s7] sm:$0xff] %v664_v4 }

</bundles_post_ra>
